<compile_context>
chip_gen: v6e
topology: v6e:2x2x1
jax: 0.10.0
libtpu: 0.0.40
codegen_flags: <defaults>
</compile_context>

<pallas_src>
import jax
import jax.numpy as jnp
from jax.experimental import pallas as pl
from jax.experimental.pallas import tpu as pltpu


# ----------------------------- Pallas kernel -----------------------------------

def _sample_responses_kernel(scale_ref, obs_ref, factor_ref, wmean_ref,
                             wnoise_ref, rnoise_ref, out_ref):
    # scale_ref:  (1,)     f32 SMEM  -- out_std (runtime scalar, no recompile on change)
    # obs_ref:    (D, tm)  f32 VMEM  -- observations, feature axis on sublanes, lane-dense tile
    # factor_ref: (D, D)   f32 VMEM  -- scaled_covar_factor = U @ diag(sqrt(S^-1))
    # wmean_ref:  (1, D)   f32 VMEM  -- scaled_covar @ scaled_mean (zeros if centred)
    # wnoise_ref: (N, D)   f32 VMEM  -- standard-normal weight noise
    # rnoise_ref: (N, tm)  f32 VMEM  -- standard-normal response noise (per-tile slice)
    # out_ref:    (N, tm)  f32 VMEM  -- lane-dense output tile (permute(2,0,1) layout)
    scale = scale_ref[0]

    # Posterior weight sample: w = covar@mean + out_std * (eps @ factor.T)   -> (N, D)
    # (recomputed per lane tile; it is a 1xDxD matvec, negligible next to the obs DMA)
    w = wmean_ref[...] + scale * jax.lax.dot_general(
        wnoise_ref[...], factor_ref[...],
        dimension_numbers=(((1,), (1,)), ((), ())),      # noise @ factor.T
        preferred_element_type=jnp.float32,
    )

    # Predictive mean: (N, D) @ (D, tm) -> (N, tm); obs already (D, M), so the MXU rhs is
    # (K, N_lanes) with no XLU transpose and M on the lane axis (lane-dense output).
    mean = jax.lax.dot_general(
        w, obs_ref[...],
        dimension_numbers=(((1,), (0,)), ((), ())),
        preferred_element_type=jnp.float32,
    )

    # torch.normal(mean, out_std * ones_like(mean))
    out_ref[...] = mean + scale * rnoise_ref[...]


def sample_responses_pallas(obs_t, factor, w_mean, w_noise, r_noise, out_std,
                            *, lane_tile=2048):
    """Fused (weights sample) -> (w @ obs) -> (+ out_std * noise) in one pallas_call.

    obs_t:   (D, M) f32   w_noise: (N, D) f32   r_noise: (N, M) f32   out_std: (1,) f32
    Returns (N, M) f32, lane-dense (already in permute(2,0,1) order).
    """
    D, M = obs_t.shape
    N = w_noise.shape[0]
    # Lane-axis tiling: full extent for small M (single step, no padding); for large M use
    # big multiples of 128 (>=512-wide tiles reach ~85% of HBM roofline; 128-multiples give
    # unmasked vst). Partial last tiles are safe: each output column depends only on its own
    # obs column, and Pallas clips out-of-bounds stores.
    tm = M if M <= lane_tile else lane_tile
    grid = (pl.cdiv(M, tm),)

    return pl.pallas_call(
        _sample_responses_kernel,
        out_shape=jax.ShapeDtypeStruct((N, M), jnp.float32),
        grid=grid,
        in_specs=[
            pl.BlockSpec(memory_space=pltpu.MemorySpace.SMEM),   # out_std scalar
            pl.BlockSpec((D, tm), lambda i: (0, i)),             # obs, tiled on lanes
            pl.BlockSpec((D, D), lambda i: (0, 0)),              # covar factor (resident)
            pl.BlockSpec((1, D), lambda i: (0, 0)),              # weight mean (resident)
            pl.BlockSpec((N, D), lambda i: (0, 0)),              # weight noise (resident)
            pl.BlockSpec((N, tm), lambda i: (0, i)),             # response noise, tiled
        ],
        out_specs=pl.BlockSpec((N, tm), lambda i: (0, i)),
        compiler_params=pltpu.CompilerParams(
            # M tiles are independent: shard across v7x's two TensorCores.
            dimension_semantics=("parallel",),
        ),
    )(out_std, obs_t, factor, w_mean, w_noise, r_noise)


# ----------------------------- plain-JAX glue -----------------------------------

def _posterior_factor_and_mean(scaled_mean, scaled_precision, eps, zero_mean):
    """OnlineBayesLinReg._get_svd_scaled_covar -> (scaled_covar_factor, covar @ mean).

    Only the tiny (dim, dim) SVD lives here; everything downstream is fused into the kernel.
    The factor is NOT scaled by out_std (out_std is applied in-kernel from the SMEM scalar).
    """
    dim = scaled_mean.shape[0]
    identity = jnp.eye(dim, dtype=scaled_precision.dtype)
    correction = (1.0 + jnp.mean(jnp.abs(jnp.diag(scaled_precision)))) * eps * identity
    # TODO(synk): torch runs this in float64; the TPU path keeps the small SVD in float32.
    u, s, _vh = jnp.linalg.svd(scaled_precision + correction)
    s = jnp.where(s != 0.0, 1.0 / s, s)
    s = jnp.where(s < eps, eps, s)
    factor = u @ jnp.diag(jnp.sqrt(s))                                   # (dim, dim)
    if zero_mean:
        w_mean = jnp.zeros((1, dim), jnp.float32)
    else:
        w_mean = ((factor @ factor.T) @ scaled_mean)[None, :].astype(jnp.float32)
    return factor.astype(jnp.float32), w_mean


def successor_uncertainty_forward(observations, params, key, out_std, *,
                                  bias=False, zero_mean_weights=False, eps=1e-6, n=1):
    """Forward pass of SuccessorUncertaintyModel (== sample_responses(observations, n)).

    NB: the PyTorch module literally does `raise self.sample_responses(...)` -- an obvious
    typo for `return`; we implement the intended semantics.
    """
    # out_std as a traced (1,) f32 array: runtime scalar, no recompile when it changes.
    out_std = jnp.asarray(out_std, jnp.float32).reshape((1,))

    # _preprocess_inputs: obs_dims=2, normalise=False, optional bias column
    obs = observations
    if obs.ndim == 2:
        obs = obs[None]                                   # unsqueeze(0)
    if bias:
        ones = jnp.ones(obs.shape[:-1] + (1,), obs.dtype)
        obs = jnp.concatenate([ones, obs], axis=-1)       # _prepend_unit_vector

    n_obs, n_act, feat = obs.shape
    M = n_obs * n_act
    # (D, M): feature axis on sublanes, obs*act axis lane-dense for the kernel.
    obs_t = obs.reshape(M, feat).T.astype(jnp.float32)

    factor, w_mean = _posterior_factor_and_mean(
        params["scaled_mean"], params["scaled_precision"], eps, zero_mean_weights)

    # ONE RNG dispatch covering both the weight noise and the response noise.
    noise = jax.random.normal(key, (n, feat + M), jnp.float32)
    w_noise = noise[:, :feat]
    r_noise = noise[:, feat:]

    out = sample_responses_pallas(obs_t, factor, w_mean, w_noise, r_noise, out_std)
    # Already in permute(2, 0, 1) order: pure reshape (n, n_obs*n_act) -> (n, n_obs, n_act).
    return out.reshape(n, n_obs, n_act)


def init_params(input_size, bias=False):
    """Deterministic OnlineBayesLinReg state as set in __init__."""
    dim = input_size + int(bias)
    return {
        "scaled_mean": jnp.zeros((dim,), jnp.float32),
        "scaled_precision": jnp.eye(dim, dtype=jnp.float32),
    }


# ----------------------------------- main ---------------------------------------

if __name__ == "__main__":
    input_size = 32          # hidden feature size
    n_obs, n_act = 2, 8      # small: 2 observations, 8 actions each
    bias = False
    out_std = 1.0

    key = jax.random.PRNGKey(0)
    k_obs, k_fwd = jax.random.split(key)

    observations = jax.random.normal(k_obs, (n_obs, n_act, input_size), jnp.float32)
    params = init_params(input_size, bias=bias)

    out = successor_uncertainty_forward(
        observations, params, k_fwd, out_std,
        bias=bias, zero_mean_weights=False, eps=1e-6)
    out = jax.block_until_ready(out)

    assert out.shape == (1, n_obs, n_act), out.shape
    assert out.dtype == jnp.float32
    assert bool(jnp.all(jnp.isfinite(out)))
    print("KERNEL_OK")
</pallas_src>

<mosaic_0001>
module attributes {stable_mosaic.version = 11 : i64} {
  func.func @_sample_responses_kernel(%arg0: i32, %arg1: memref<1xf32, #tpu.memory_space<smem>>, %arg2: memref<32x16xf32, #tpu.memory_space<vmem>>, %arg3: memref<32x32xf32, #tpu.memory_space<vmem>>, %arg4: memref<1x32xf32, #tpu.memory_space<vmem>>, %arg5: memref<1x32xf32, #tpu.memory_space<vmem>>, %arg6: memref<1x16xf32, #tpu.memory_space<vmem>>, %arg7: memref<1x16xf32, #tpu.memory_space<vmem>>) attributes {dimension_semantics = [#tpu.dimension_semantics<parallel>], iteration_bounds = array<i64: 1>, scalar_prefetch = 0 : i64, scratch_operands = 0 : i64, tpu.core_type = #tpu.core_type<tc>, window_params = [{transform_indices = @transform_0, window_bounds = array<i64: 1>}, {transform_indices = @transform_1, window_bounds = array<i64: 32, 16>}, {pipeline_mode = #tpu.pipeline_mode<synchronous>, transform_indices = @transform_2, window_bounds = array<i64: 32, 32>}, {pipeline_mode = #tpu.pipeline_mode<synchronous>, transform_indices = @transform_3, window_bounds = array<i64: 1, 32>}, {pipeline_mode = #tpu.pipeline_mode<synchronous>, transform_indices = @transform_4, window_bounds = array<i64: 1, 32>}, {transform_indices = @transform_5, window_bounds = array<i64: 1, 16>}, {transform_indices = @transform_6, window_bounds = array<i64: 1, 16>}]} {
    %c0 = arith.constant 0 : index
    %0 = memref.load %arg1[%c0] : memref<1xf32, #tpu.memory_space<smem>>
    %c0_0 = arith.constant 0 : index
    %c0_1 = arith.constant 0 : index
    %1 = vector.load %arg4[%c0_0, %c0_1] : memref<1x32xf32, #tpu.memory_space<vmem>>, vector<1x32xf32>
    %c0_2 = arith.constant 0 : index
    %c0_3 = arith.constant 0 : index
    %2 = vector.load %arg5[%c0_2, %c0_3] : memref<1x32xf32, #tpu.memory_space<vmem>>, vector<1x32xf32>
    %c0_4 = arith.constant 0 : index
    %c0_5 = arith.constant 0 : index
    %3 = vector.load %arg3[%c0_4, %c0_5] : memref<32x32xf32, #tpu.memory_space<vmem>>, vector<32x32xf32>
    %cst = arith.constant dense<0.000000e+00> : vector<1x32xf32>
    %4 = tpu.matmul %2, %3, %cst {dimension_numbers = #tpu.dot_dimension_numbers<[1], [1], [0], [0], [0, 0, 1, 0], [], []>} : vector<1x32xf32>, vector<32x32xf32>, vector<1x32xf32> -> vector<1x32xf32>
    %5 = vector.broadcast %0 : f32 to vector<1x32xf32>
    %6 = arith.mulf %5, %4 : vector<1x32xf32>
    %7 = arith.addf %1, %6 : vector<1x32xf32>
    %c0_6 = arith.constant 0 : index
    %c0_7 = arith.constant 0 : index
    %8 = vector.load %arg2[%c0_6, %c0_7] : memref<32x16xf32, #tpu.memory_space<vmem>>, vector<32x16xf32>
    %cst_8 = arith.constant dense<0.000000e+00> : vector<1x16xf32>
    %9 = tpu.matmul %7, %8, %cst_8 {dimension_numbers = #tpu.dot_dimension_numbers<[1], [0], [0], [1], [0, 0, 1, 1], [], []>} : vector<1x32xf32>, vector<32x16xf32>, vector<1x16xf32> -> vector<1x16xf32>
    %c0_9 = arith.constant 0 : index
    %c0_10 = arith.constant 0 : index
    %10 = vector.load %arg6[%c0_9, %c0_10] : memref<1x16xf32, #tpu.memory_space<vmem>>, vector<1x16xf32>
    %11 = vector.broadcast %0 : f32 to vector<1x16xf32>
    %12 = arith.mulf %11, %10 : vector<1x16xf32>
    %13 = arith.addf %9, %12 : vector<1x16xf32>
    %c0_11 = arith.constant 0 : index
    %c0_12 = arith.constant 0 : index
    %14 = vector.load %arg7[%c0_11, %c0_12] : memref<1x16xf32, #tpu.memory_space<vmem>>, vector<1x16xf32>
    tpu.vector_store %arg7[%c0_11, %c0_12], %13 {strides = array<i32>} : memref<1x16xf32, #tpu.memory_space<vmem>>, vector<1x16xf32>,
    return
  }
  func.func @transform_0(%arg0: i32) -> i32 {
    %c0_i32 = arith.constant 0 : i32
    %c0_i32_0 = arith.constant 0 : i32
    return %c0_i32 : i32
  }
  func.func @transform_1(%arg0: i32) -> (i32, i32) {
    %c0_i32 = arith.constant 0 : i32
    %c0_i32_0 = arith.constant 0 : i32
    return %c0_i32, %arg0 : i32, i32
  }
  func.func @transform_2(%arg0: i32) -> (i32, i32) {
    %c0_i32 = arith.constant 0 : i32
    %c0_i32_0 = arith.constant 0 : i32
    %c0_i32_1 = arith.constant 0 : i32
    return %c0_i32, %c0_i32_0 : i32, i32
  }
  func.func @transform_3(%arg0: i32) -> (i32, i32) {
    %c0_i32 = arith.constant 0 : i32
    %c0_i32_0 = arith.constant 0 : i32
    %c0_i32_1 = arith.constant 0 : i32
    return %c0_i32, %c0_i32_0 : i32, i32
  }
  func.func @transform_4(%arg0: i32) -> (i32, i32) {
    %c0_i32 = arith.constant 0 : i32
    %c0_i32_0 = arith.constant 0 : i32
    %c0_i32_1 = arith.constant 0 : i32
    return %c0_i32, %c0_i32_0 : i32, i32
  }
  func.func @transform_5(%arg0: i32) -> (i32, i32) {
    %c0_i32 = arith.constant 0 : i32
    %c0_i32_0 = arith.constant 0 : i32
    return %c0_i32, %arg0 : i32, i32
  }
  func.func @transform_6(%arg0: i32) -> (i32, i32) {
    %c0_i32 = arith.constant 0 : i32
    %c0_i32_0 = arith.constant 0 : i32
    return %c0_i32, %arg0 : i32, i32
  }
}

</mosaic_0001>

<bundles_post_ra>
// kernel: tpu_custom_call.1
= control target key start
LH: loop header
LB: loop body
LE: loop exit
PB: predicated region body
PF: predicated region fallthrough
CT: control target
= control target key end

     0   :  { %vm32_vm0 = vcmask 261120   ;;  %v279_v1 = vmov 0.0   ;;  %vm280_vm1 = vmmov 0   ;;  %s362_s0 = inlined_call_operand.<no memory space> [shape: f32[1], index: 0, kind: input, shape index: {}]   ;;  %s363_s1 = inlined_call_operand.vmem [shape: f32[32,16], index: 1, kind: input, shape index: {}]   ;;  %s364_s2 = inlined_call_operand.vmem [shape: f32[32,32], index: 2, kind: input, shape index: {}]   ;;  %s365_s3 = inlined_call_operand.vmem [shape: f32[1,32], index: 3, kind: input, shape index: {}]   ;;  %s366_s4 = inlined_call_operand.vmem [shape: f32[1,32], index: 4, kind: input, shape index: {}]   ;;  %s367_s5 = inlined_call_operand.vmem [shape: f32[1,16], index: 5, kind: input, shape index: {}]   ;;  %s368_s6 = inlined_call_operand.hbm [shape: f32[1,16], index: 6, kind: output, shape index: {}]  }
   0x1   :  { %v31_v0 = vld [vmem:[%s364_s2 + $0x18] sm:$0xff]  ;;  %232 = vmatprep.subr.mxu0 %v279_v1  ;;  %240 = vmatprep.mubr.msk.f32.mxu0 %vm280_vm1, %v279_v1 }
   0x2   :  { %v124_v2 = vld [vmem:[%s363_s1 + $0x18] sm:$0xff]  ;;  %233 = vmatpush3.xpose.msk.msra.mxu0 %vm32_vm0, %v31_v0  ;;  %243 = vmatprep.subr.mxu1 %v279_v1 }
   0x3   :  { %12 = vsyncpa [#allocation4], 0  ;;  %234 = vmatprep.subr.mxu0 %v279_v1  ;;  %v30_v3 = vld [vmem:[%s364_s2 + $0x10] sm:$0xff]  ;;  %244 = vmatpush3.msra.mxu1 %v124_v2  ;;  %v29_v4 = vld [vmem:[%s364_s2 + $0x8] sm:$0xff]  ;;  %v118_v10 = vstv %s362_s0  ;;  %vm200_vm2 = vcmask 122880  }
   0x4   :  { %245 = vmatprep.subr.mxu1 %v279_v1  ;;  %251 = vmatprep.mubr.msk.f32.mxu1 %vm280_vm1, %v279_v1  ;;  %v28_v5 = vld [vmem:[%s364_s2] sm:$0xff]  ;;  %v123_v7 = vld [vmem:[%s363_s1 + $0x10] sm:$0xff]  ;;  %v122_v8 = vld [vmem:[%s363_s1 + $0x8] sm:$0xff] }
   0x5   :  { %v27_v6 = vld [vmem:[%s366_s4] sm:$0x1]  ;;  %246 = vmatpush3.msra.mxu1 %v123_v7 }
   0x6   :  { %235 = vmatpush3.xpose.msk.msra.mxu0 %vm32_vm0, %v30_v3  ;;  %247 = vmatprep.subr.mxu1 %v279_v1  ;;  %v121_v9 = vld [vmem:[%s363_s1] sm:$0xff]  ;;  %s281_s1 = smov [#allocation3]  }
   0x7   :  { %236 = vmatprep.subr.mxu0 %v279_v1  ;;  %248 = vmatpush3.msra.mxu1 %v122_v8  ;;  %v26_v11 = vld [vmem:[%s365_s3] sm:$0x1]  ;;  %s208_s19 = sshll.u32 %s281_s1, 4  ;;  %s209_s19 = int_to_ptr.vmem [resolvable:$true] %s208_s19 }
   0x8   :  { %249 = vmatprep.subr.mxu1 %v279_v1  ;;  %v125_v16 = vld [vmem:[%s367_s5] sm:$0x1]  ;;  %s257_s0 = scalar_lea.vmem %s209_s19, 16  ;;  %s261_s3 = scalar_lea.vmem %s209_s19, 32 }
   0x9   :  { %250 = vmatpush3.msra.mxu1 %v121_v9  ;;  %v126_v17 = vmul.f32 %v125_v16, %v118_v10  ;;  %p258_p0 = scmp.ne.s32.totalorder %s209_s19, %s257_s0  ;;  %p262_p1 = scmp.lt.s32.totalorder %s209_s19, %s209_s19 }
   0xa   :  { %237 = vmatpush3.xpose.msk.msra.mxu0 %vm32_vm0, %v29_v4  ;;  %p263_p2 = scmp.lt.s32.totalorder %s261_s3, %s257_s0 }
   0xb   :  { %238 = vmatprep.subr.mxu0 %v279_v1 }
   0xc   :  { %p264_p3 = por %p263_p2, %p262_p1 }
   0xe   :  { %239 = vmatpush3.xpose.msk.msra.mxu0 %vm32_vm0, %v28_v5  ;;  %p265_p4 = pnand %p264_p3, %p258_p0 }
  0x11   :  { %241 = vmatmul.mubr.msk.f32.vlgmr.msra.gmra.mxu0 %vm32_vm0, %v27_v6 }
  0xd1   :  { %v114_v12 = vpop.f32.mrf.mxu0 }
  0xd2   :  { %v119_v13 = vmul.f32 %v118_v10, %v114_v12 }
  0xd3   :  { %v242_v14 = vpop.f32.mrf.mxu0 }
  0xd4   :  { %v120_v15 = vadd.f32 %v119_v13, %v26_v11 }
  0xd6   :  { %252 = vmatmul.mubr.msk.f32.vlgmr.msra.gmra.mxu1 %vm32_vm0, %v120_v15 }
 0x196   :  { %v196_v18 = vpop.f32.mrf.mxu1 }
 0x197   :  { %v197_v19 = vadd.f32 %v196_v18, %v126_v17 }
 0x198   :  { %v253_v20 = vpop.f32.mrf.mxu1 }
 0x199   :  { %201 = vst.msk [vmem:[#allocation3] sm:$0x1] %vm200_vm2, %v197_v19 }
 0x19a   :  { %268 = shalt.err (!%p265_p4)
}
 0x19b   :  { %211 = dma.vmem_to_hbm [thread:$0]  %s209_s19, 16, %s368_s6, [#allocation4]  }
 0x19c   :  { %277 = dma.done.wait [#allocation4], 16  }
 0x19d   :  { %278 = vsyncadd [#allocation4], 4294967280 }
 0x19e   :  { %215 = vsyncpa [#allocation4], 1 }

</bundles_post_ra>
